<compile_context>
chip_gen: v5e
topology: v5e:2x2
jax: 0.10.0
libtpu: 0.0.40
codegen_flags: <defaults>
</compile_context>

<pallas_src>
import functools

import jax
import jax.numpy as jnp
from jax.experimental import pallas as pl
from jax.experimental.pallas import tpu as pltpu

BN_EPS = 1e-5          # torch.nn.BatchNorm1d default
LANE = 128             # TPU lane width
MAX_UNROLL_MID = 4     # static unroll threshold for the residual stack


def _round_up(n, m):
    return (n + m - 1) // m * m


def _pad_to(a, shape):
    return jnp.pad(a, [(0, s - d) for d, s in zip(a.shape, shape)])


def _vmem_capacity_bytes():
    try:
        return int(pltpu.get_tpu_info().vmem_capacity_bytes)
    except Exception:
        return 64 << 20   # conservative: v7x per-TensorCore VMEM


def _lrelu(h, slope):
    # Valid for 0 < slope < 1: vmul+vmax instead of vmul+vcmp+vselect.
    return jnp.maximum(h, slope * h)


# ---------------------------------------------------------------------------
# Kernels
# ---------------------------------------------------------------------------
def _resident_kernel(x_ref, w_in_ref, b_in_ref, w_mid_ref, b_mid_ref,
                     w_out_ref, b_out_ref, o_ref, *, num_mid, leaky_slope):
    """Whole-network forward for one batch tile; full weight stack VMEM-resident."""
    cdt = w_in_ref.dtype  # bf16 MXU input dtype

    h = jnp.dot(x_ref[...], w_in_ref[...],
                preferred_element_type=jnp.float32) + b_in_ref[...]
    h = _lrelu(h, leaky_slope)                     # f32 residual carry

    def layer(i, h):
        t = jnp.dot(h.astype(cdt), w_mid_ref[i],
                    preferred_element_type=jnp.float32) + b_mid_ref[i]
        return h + _lrelu(t, leaky_slope)

    if num_mid > 0:
        if num_mid <= MAX_UNROLL_MID:
            for i in range(num_mid):               # short: unroll at trace time
                h = layer(i, h)
        else:                                      # deep: bounded loop body
            h = jax.lax.fori_loop(0, num_mid, layer, h, unroll=2)

    o_ref[...] = (jnp.dot(h.astype(cdt), w_out_ref[...],
                          preferred_element_type=jnp.float32)
                  + b_out_ref[...]).astype(o_ref.dtype)


def _streaming_kernel(x_ref, w_in_ref, b_in_ref, w_mid_ref, b_mid_ref,
                      w_out_ref, b_out_ref, o_ref, h_ref, *, leaky_slope):
    """Grid = (batch_tile, mid_layer). One (hid,hid) weight block streamed per step."""
    l = pl.program_id(1)
    cdt = w_in_ref.dtype

    @pl.when(l == 0)
    def _():
        h0 = jnp.dot(x_ref[...], w_in_ref[...],
                     preferred_element_type=jnp.float32) + b_in_ref[...]
        h_ref[...] = _lrelu(h0, leaky_slope)

    h = h_ref[...]
    t = jnp.dot(h.astype(cdt), w_mid_ref[0],
                preferred_element_type=jnp.float32) + b_mid_ref[0]
    h_ref[...] = h + _lrelu(t, leaky_slope)

    @pl.when(l == pl.num_programs(1) - 1)
    def _():
        o_ref[...] = (jnp.dot(h_ref[...].astype(cdt), w_out_ref[...],
                              preferred_element_type=jnp.float32)
                      + b_out_ref[...]).astype(o_ref.dtype)


# ---------------------------------------------------------------------------
# One-time host-side preparation: BN fold + lane padding + bf16 cast
# ---------------------------------------------------------------------------
def prepare_params(params, *, compute_dtype=jnp.bfloat16):
    w_in, b_in = params["w_in"], params["b_in"]
    s_in = params["g_in"] * jax.lax.rsqrt(params["rv_in"] + BN_EPS)
    w_in_f = w_in * s_in
    b_in_f = (b_in - params["rm_in"]) * s_in + params["be_in"]

    num_mid = params["w_mid"].shape[0]
    w_out, b_out = params["w_out"], params["b_out"]

    in_dim, hid = w_in_f.shape
    out_dim = w_out.shape[1]
    in_p = _round_up(in_dim, LANE)
    hid_p = _round_up(hid, LANE)
    out_p = _round_up(out_dim, LANE)

    if num_mid > 0:
        s_mid = params["g_mid"] * jax.lax.rsqrt(params["rv_mid"] + BN_EPS)
        w_mid_f = params["w_mid"] * s_mid
        b_mid_f = (params["b_mid"] - params["rm_mid"]) * s_mid + params["be_mid"]
        w_mid_p = _pad_to(w_mid_f, (num_mid, hid_p, hid_p)).astype(compute_dtype)
        b_mid_p = _pad_to(b_mid_f, (num_mid, 1, hid_p)).astype(jnp.float32)
    else:
        # Tiny unread placeholder (zero-sized VMEM operands can fail lowering).
        w_mid_p = jnp.zeros((1, 8, LANE), compute_dtype)
        b_mid_p = jnp.zeros((1, 1, LANE), jnp.float32)

    return {
        "w_in":  _pad_to(w_in_f, (in_p, hid_p)).astype(compute_dtype),
        "b_in":  _pad_to(b_in_f, (1, hid_p)).astype(jnp.float32),
        "w_mid": w_mid_p,
        "b_mid": b_mid_p,
        "w_out": _pad_to(w_out, (hid_p, out_p)).astype(compute_dtype),
        "b_out": _pad_to(b_out, (1, out_p)).astype(jnp.float32),
        "num_mid": num_mid,
        "in_dim": in_dim,
        "out_dim": out_dim,
    }


# ---------------------------------------------------------------------------
# Wrapper
# ---------------------------------------------------------------------------
def _choose_tm(B):
    if B <= 16:
        return 16
    # >=2 grid steps (both v7x TensorCores busy), 16-row packing, <=256 rows.
    return min(256, _round_up((B + 1) // 2, 16))


def resdnn_forward(x, prep, *, leaky_slope, force_stream=False):
    """x: [B, input_size] f32.  prep: dict from prepare_params()."""
    B, in_dim = x.shape
    assert in_dim == prep["in_dim"]
    in_p, hid_p = prep["w_in"].shape
    out_p = prep["w_out"].shape[1]
    num_mid = prep["num_mid"]

    tm = _choose_tm(B)
    b_pad = _round_up(B, tm)
    n_btiles = b_pad // tm
    xb = jnp.pad(x.astype(jnp.bfloat16), ((0, b_pad - B), (0, in_p - in_dim)))

    def nbytes(a):
        return int(a.size) * a.dtype.itemsize

    cap = _vmem_capacity_bytes()
    budget = cap - (8 << 20)
    w_all = sum(nbytes(prep[k]) for k in ("w_in", "b_in", "w_mid", "b_mid", "w_out", "b_out"))
    w_io = sum(nbytes(prep[k]) for k in ("w_in", "b_in", "w_out", "b_out"))
    layer_bytes = hid_p * hid_p * 2 + hid_p * 4
    act_bytes = 2 * tm * in_p * 2 + 2 * tm * out_p * 4 + 4 * tm * hid_p * 4

    stream = (num_mid > 0) and (force_stream or (w_all + act_bytes > budget))

    flops = 2 * b_pad * (in_p * hid_p + num_mid * hid_p * hid_p + hid_p * out_p)
    wread = w_all if not stream else (
        w_io + n_btiles * (nbytes(prep["w_mid"]) + nbytes(prep["b_mid"])))
    cost = pl.CostEstimate(flops=int(flops), transcendentals=0,
                           bytes_accessed=int(b_pad * in_p * 2 + b_pad * out_p * 4 + wread))

    def run(single_buffer):
        def const_spec(shape):
            idx = lambda *_: (0,) * len(shape)
            if single_buffer:
                # Constant index map -> a second buffer is pure VMEM waste.
                return pl.BlockSpec(shape, idx, pipeline_mode=pl.Buffered(1))
            return pl.BlockSpec(shape, idx)

        wfac = 1 if single_buffer else 2
        if stream:
            need = wfac * w_io + 2 * layer_bytes + act_bytes
            grid = (n_btiles, num_mid)
            kernel = functools.partial(_streaming_kernel, leaky_slope=leaky_slope)
            in_specs = [
                pl.BlockSpec((tm, in_p), lambda i, l: (i, 0)),              # x
                const_spec((in_p, hid_p)),                                  # w_in (resident)
                const_spec((1, hid_p)),                                     # b_in
                pl.BlockSpec((1, hid_p, hid_p), lambda i, l: (l, 0, 0)),    # w_mid (streamed)
                pl.BlockSpec((1, 1, hid_p), lambda i, l: (l, 0, 0)),        # b_mid (streamed)
                const_spec((hid_p, out_p)),                                 # w_out
                const_spec((1, out_p)),                                     # b_out
            ]
            out_spec = pl.BlockSpec((tm, out_p), lambda i, l: (i, 0))
            scratch = [pltpu.VMEM((tm, hid_p), jnp.float32)]                # residual carry
            dims = ("parallel", "arbitrary")
        else:
            need = wfac * w_all + act_bytes
            grid = (n_btiles,)
            kernel = functools.partial(_resident_kernel, num_mid=num_mid,
                                       leaky_slope=leaky_slope)
            in_specs = [
                pl.BlockSpec((tm, in_p), lambda i: (i, 0)),                 # x
                const_spec((in_p, hid_p)),                                  # w_in
                const_spec((1, hid_p)),                                     # b_in
                const_spec(tuple(prep["w_mid"].shape)),                     # w_mid stack
                const_spec(tuple(prep["b_mid"].shape)),                     # b_mid stack
                const_spec((hid_p, out_p)),                                 # w_out
                const_spec((1, out_p)),                                     # b_out
            ]
            out_spec = pl.BlockSpec((tm, out_p), lambda i: (i, 0))
            scratch = []
            dims = ("parallel",)

        vmem_limit = int(min(cap - (4 << 20), max(need + (16 << 20), 32 << 20)))

        return pl.pallas_call(
            kernel,
            out_shape=jax.ShapeDtypeStruct((b_pad, out_p), jnp.float32),
            grid=grid,
            in_specs=in_specs,
            out_specs=out_spec,
            scratch_shapes=scratch,
            compiler_params=pltpu.CompilerParams(
                dimension_semantics=dims,
                vmem_limit_bytes=vmem_limit),
            cost_estimate=cost,
        )(xb, prep["w_in"], prep["b_in"], prep["w_mid"], prep["b_mid"],
          prep["w_out"], prep["b_out"])

    try:
        out = run(single_buffer=True)
    except Exception:
        # pl.Buffered(1) unsupported on this build -> default double buffering.
        out = run(single_buffer=False)

    return out[:B, :prep["out_dim"]]


# ---------------------------------------------------------------------------
# Synthetic parameters (PyTorch-shaped; Linear weights pre-transposed to [in,out])
# ---------------------------------------------------------------------------
def init_params(key, input_size, hidden_size, output_size, num_layers):
    num_mid = num_layers - 2
    ks = jax.random.split(key, 16)

    def w(k, ins, outs, extra=()):
        return (jax.random.normal(k, extra + (ins, outs), jnp.float32)
                * (1.0 / jnp.sqrt(ins)))

    return {
        "w_in":  w(ks[0], input_size, hidden_size),
        "b_in":  0.01 * jax.random.normal(ks[1], (1, hidden_size), jnp.float32),
        "g_in":  1.0 + 0.1 * jax.random.normal(ks[2], (1, hidden_size), jnp.float32),
        "be_in": 0.1 * jax.random.normal(ks[3], (1, hidden_size), jnp.float32),
        "rm_in": 0.1 * jax.random.normal(ks[4], (1, hidden_size), jnp.float32),
        "rv_in": jax.random.uniform(ks[5], (1, hidden_size), jnp.float32, 0.5, 1.5),
        "w_mid":  w(ks[6], hidden_size, hidden_size, extra=(num_mid,)),
        "b_mid":  0.01 * jax.random.normal(ks[7], (num_mid, 1, hidden_size), jnp.float32),
        "g_mid":  1.0 + 0.1 * jax.random.normal(ks[8], (num_mid, 1, hidden_size), jnp.float32),
        "be_mid": 0.1 * jax.random.normal(ks[9], (num_mid, 1, hidden_size), jnp.float32),
        "rm_mid": 0.1 * jax.random.normal(ks[10], (num_mid, 1, hidden_size), jnp.float32),
        "rv_mid": jax.random.uniform(ks[11], (num_mid, 1, hidden_size), jnp.float32, 0.5, 1.5),
        "w_out": w(ks[12], hidden_size, output_size),
        "b_out": 0.01 * jax.random.normal(ks[13], (1, output_size), jnp.float32),
    }


def resdnn_reference(x, params, *, leaky_slope):
    """Pure-JAX f32 reference with original (un-folded) eval-mode semantics."""
    def bn_lrelu(h, g, be, rm, rv):
        h = (h - rm) * (g * jax.lax.rsqrt(rv + BN_EPS)) + be
        return jnp.where(h >= 0, h, leaky_slope * h)

    h = x @ params["w_in"] + params["b_in"]
    h = bn_lrelu(h, params["g_in"], params["be_in"], params["rm_in"], params["rv_in"])
    for i in range(params["w_mid"].shape[0]):
        t = h @ params["w_mid"][i] + params["b_mid"][i]
        t = bn_lrelu(t, params["g_mid"][i], params["be_mid"][i],
                     params["rm_mid"][i], params["rv_mid"][i])
        h = h + t
    return h @ params["w_out"] + params["b_out"]


if __name__ == "__main__":
    LEAKY = 0.15
    key = jax.random.PRNGKey(0)

    cases = [
        # (B, input, hidden, output, num_layers, force_stream)
        (8,   16, 32,  16, 5, False),   # tiny, resident, unrolled mid stack
        (8,   16, 32,  16, 5, True),    # same net through the layer-streaming path
        (8,   16, 32,  16, 2, False),   # num_mid == 0 (input layer -> output Linear)
        (300, 52, 256, 52, 9, False),   # grid>1 batch, fori_loop mid stack, batch padding
    ]

    for idx, (B, INPUT, HIDDEN, OUTPUT, NUM_LAYERS, force_stream) in enumerate(cases):
        kc = jax.random.fold_in(key, idx)
        kx, kp = jax.random.split(kc)
        x = jax.random.normal(kx, (B, INPUT), jnp.float32)
        params = init_params(kp, INPUT, HIDDEN, OUTPUT, NUM_LAYERS)

        prep = prepare_params(params)                    # one-time fold/pad/cast
        out = jax.block_until_ready(
            resdnn_forward(x, prep, leaky_slope=LEAKY, force_stream=force_stream))
        ref = resdnn_reference(x, params, leaky_slope=LEAKY)

        assert out.shape == (B, OUTPUT), f"case {idx}: bad shape {out.shape}"
        err = float(jnp.max(jnp.abs(out - ref)))
        scale = float(jnp.max(jnp.abs(ref))) + 1.0
        # bf16 weights/activations -> ~1e-2 relative error vs the f32 reference.
        assert err <= 4e-2 * scale, f"case {idx}: max abs err={err} (scale={scale})"

    print("KERNEL_OK")
</pallas_src>

<mosaic_0001>
module attributes {stable_mosaic.version = 11 : i64} {
  func.func @_resident_kernel(%arg0: i32, %arg1: memref<16x128xbf16, #tpu.memory_space<vmem>>, %arg2: memref<128x128xbf16, #tpu.memory_space<vmem>>, %arg3: memref<1x128xf32, #tpu.memory_space<vmem>>, %arg4: memref<3x128x128xbf16, #tpu.memory_space<vmem>>, %arg5: memref<3x1x128xf32, #tpu.memory_space<vmem>>, %arg6: memref<128x128xbf16, #tpu.memory_space<vmem>>, %arg7: memref<1x128xf32, #tpu.memory_space<vmem>>, %arg8: memref<16x128xf32, #tpu.memory_space<vmem>>) attributes {dimension_semantics = [#tpu.dimension_semantics<parallel>], iteration_bounds = array<i64: 1>, scalar_prefetch = 0 : i64, scratch_operands = 0 : i64, tpu.core_type = #tpu.core_type<tc>, window_params = [{transform_indices = @transform_0, window_bounds = array<i64: 16, 128>}, {pipeline_mode = #tpu.pipeline_mode<synchronous>, transform_indices = @transform_1, window_bounds = array<i64: 128, 128>}, {pipeline_mode = #tpu.pipeline_mode<synchronous>, transform_indices = @transform_2, window_bounds = array<i64: 1, 128>}, {pipeline_mode = #tpu.pipeline_mode<synchronous>, transform_indices = @transform_3, window_bounds = array<i64: 3, 128, 128>}, {pipeline_mode = #tpu.pipeline_mode<synchronous>, transform_indices = @transform_4, window_bounds = array<i64: 3, 1, 128>}, {pipeline_mode = #tpu.pipeline_mode<synchronous>, transform_indices = @transform_5, window_bounds = array<i64: 128, 128>}, {pipeline_mode = #tpu.pipeline_mode<synchronous>, transform_indices = @transform_6, window_bounds = array<i64: 1, 128>}, {transform_indices = @transform_7, window_bounds = array<i64: 16, 128>}]} {
    %c0 = arith.constant 0 : index
    %c0_0 = arith.constant 0 : index
    %0 = vector.load %arg1[%c0, %c0_0] : memref<16x128xbf16, #tpu.memory_space<vmem>>, vector<16x128xbf16>
    %c0_1 = arith.constant 0 : index
    %c0_2 = arith.constant 0 : index
    %1 = vector.load %arg2[%c0_1, %c0_2] : memref<128x128xbf16, #tpu.memory_space<vmem>>, vector<128x128xbf16>
    %cst = arith.constant dense<0.000000e+00> : vector<16x128xf32>
    %2 = tpu.matmul %0, %1, %cst {dimension_numbers = #tpu.dot_dimension_numbers<[1], [0], [0], [1], [0, 0, 1, 1], [], []>} : vector<16x128xbf16>, vector<128x128xbf16>, vector<16x128xf32> -> vector<16x128xf32>
    %c0_3 = arith.constant 0 : index
    %c0_4 = arith.constant 0 : index
    %3 = vector.load %arg3[%c0_3, %c0_4] : memref<1x128xf32, #tpu.memory_space<vmem>>, vector<1x128xf32>
    %4 = vector.broadcast %3 : vector<1x128xf32> to vector<16x128xf32>
    %5 = arith.addf %2, %4 : vector<16x128xf32>
    %cst_5 = arith.constant 1.500000e-01 : f32
    %6 = vector.broadcast %cst_5 : f32 to vector<16x128xf32>
    %7 = arith.mulf %6, %5 : vector<16x128xf32>
    %8 = arith.maximumf %5, %7 : vector<16x128xf32>
    %9 = arith.truncf %8 : vector<16x128xf32> to vector<16x128xbf16>
    %c0_6 = arith.constant 0 : index
    %c0_7 = arith.constant 0 : index
    %c0_8 = arith.constant 0 : index
    %10 = vector.load %arg4[%c0_6, %c0_7, %c0_8] : memref<3x128x128xbf16, #tpu.memory_space<vmem>>, vector<1x128x128xbf16>
    %11 = vector.shape_cast %10 : vector<1x128x128xbf16> to vector<128x128xbf16>
    %cst_9 = arith.constant dense<0.000000e+00> : vector<16x128xf32>
    %12 = tpu.matmul %9, %11, %cst_9 {dimension_numbers = #tpu.dot_dimension_numbers<[1], [0], [0], [1], [0, 0, 1, 1], [], []>} : vector<16x128xbf16>, vector<128x128xbf16>, vector<16x128xf32> -> vector<16x128xf32>
    %c0_10 = arith.constant 0 : index
    %c0_11 = arith.constant 0 : index
    %c0_12 = arith.constant 0 : index
    %13 = vector.load %arg5[%c0_10, %c0_11, %c0_12] : memref<3x1x128xf32, #tpu.memory_space<vmem>>, vector<1x1x128xf32>
    %14 = vector.shape_cast %13 : vector<1x1x128xf32> to vector<1x128xf32>
    %15 = vector.broadcast %14 : vector<1x128xf32> to vector<16x128xf32>
    %16 = arith.addf %12, %15 : vector<16x128xf32>
    %cst_13 = arith.constant 1.500000e-01 : f32
    %17 = vector.broadcast %cst_13 : f32 to vector<16x128xf32>
    %18 = arith.mulf %17, %16 : vector<16x128xf32>
    %19 = arith.maximumf %16, %18 : vector<16x128xf32>
    %20 = arith.addf %8, %19 : vector<16x128xf32>
    %21 = arith.truncf %20 : vector<16x128xf32> to vector<16x128xbf16>
    %c1 = arith.constant 1 : index
    %c0_14 = arith.constant 0 : index
    %c0_15 = arith.constant 0 : index
    %22 = vector.load %arg4[%c1, %c0_14, %c0_15] : memref<3x128x128xbf16, #tpu.memory_space<vmem>>, vector<1x128x128xbf16>
    %23 = vector.shape_cast %22 : vector<1x128x128xbf16> to vector<128x128xbf16>
    %cst_16 = arith.constant dense<0.000000e+00> : vector<16x128xf32>
    %24 = tpu.matmul %21, %23, %cst_16 {dimension_numbers = #tpu.dot_dimension_numbers<[1], [0], [0], [1], [0, 0, 1, 1], [], []>} : vector<16x128xbf16>, vector<128x128xbf16>, vector<16x128xf32> -> vector<16x128xf32>
    %c1_17 = arith.constant 1 : index
    %c0_18 = arith.constant 0 : index
    %c0_19 = arith.constant 0 : index
    %25 = vector.load %arg5[%c1_17, %c0_18, %c0_19] : memref<3x1x128xf32, #tpu.memory_space<vmem>>, vector<1x1x128xf32>
    %26 = vector.shape_cast %25 : vector<1x1x128xf32> to vector<1x128xf32>
    %27 = vector.broadcast %26 : vector<1x128xf32> to vector<16x128xf32>
    %28 = arith.addf %24, %27 : vector<16x128xf32>
    %cst_20 = arith.constant 1.500000e-01 : f32
    %29 = vector.broadcast %cst_20 : f32 to vector<16x128xf32>
    %30 = arith.mulf %29, %28 : vector<16x128xf32>
    %31 = arith.maximumf %28, %30 : vector<16x128xf32>
    %32 = arith.addf %20, %31 : vector<16x128xf32>
    %33 = arith.truncf %32 : vector<16x128xf32> to vector<16x128xbf16>
    %c2 = arith.constant 2 : index
    %c0_21 = arith.constant 0 : index
    %c0_22 = arith.constant 0 : index
    %34 = vector.load %arg4[%c2, %c0_21, %c0_22] : memref<3x128x128xbf16, #tpu.memory_space<vmem>>, vector<1x128x128xbf16>
    %35 = vector.shape_cast %34 : vector<1x128x128xbf16> to vector<128x128xbf16>
    %cst_23 = arith.constant dense<0.000000e+00> : vector<16x128xf32>
    %36 = tpu.matmul %33, %35, %cst_23 {dimension_numbers = #tpu.dot_dimension_numbers<[1], [0], [0], [1], [0, 0, 1, 1], [], []>} : vector<16x128xbf16>, vector<128x128xbf16>, vector<16x128xf32> -> vector<16x128xf32>
    %c2_24 = arith.constant 2 : index
    %c0_25 = arith.constant 0 : index
    %c0_26 = arith.constant 0 : index
    %37 = vector.load %arg5[%c2_24, %c0_25, %c0_26] : memref<3x1x128xf32, #tpu.memory_space<vmem>>, vector<1x1x128xf32>
    %38 = vector.shape_cast %37 : vector<1x1x128xf32> to vector<1x128xf32>
    %39 = vector.broadcast %38 : vector<1x128xf32> to vector<16x128xf32>
    %40 = arith.addf %36, %39 : vector<16x128xf32>
    %cst_27 = arith.constant 1.500000e-01 : f32
    %41 = vector.broadcast %cst_27 : f32 to vector<16x128xf32>
    %42 = arith.mulf %41, %40 : vector<16x128xf32>
    %43 = arith.maximumf %40, %42 : vector<16x128xf32>
    %44 = arith.addf %32, %43 : vector<16x128xf32>
    %45 = arith.truncf %44 : vector<16x128xf32> to vector<16x128xbf16>
    %c0_28 = arith.constant 0 : index
    %c0_29 = arith.constant 0 : index
    %46 = vector.load %arg6[%c0_28, %c0_29] : memref<128x128xbf16, #tpu.memory_space<vmem>>, vector<128x128xbf16>
    %cst_30 = arith.constant dense<0.000000e+00> : vector<16x128xf32>
    %47 = tpu.matmul %45, %46, %cst_30 {dimension_numbers = #tpu.dot_dimension_numbers<[1], [0], [0], [1], [0, 0, 1, 1], [], []>} : vector<16x128xbf16>, vector<128x128xbf16>, vector<16x128xf32> -> vector<16x128xf32>
    %c0_31 = arith.constant 0 : index
    %c0_32 = arith.constant 0 : index
    %48 = vector.load %arg7[%c0_31, %c0_32] : memref<1x128xf32, #tpu.memory_space<vmem>>, vector<1x128xf32>
    %49 = vector.broadcast %48 : vector<1x128xf32> to vector<16x128xf32>
    %50 = arith.addf %47, %49 : vector<16x128xf32>
    %c0_33 = arith.constant 0 : index
    %c0_34 = arith.constant 0 : index
    %51 = vector.load %arg8[%c0_33, %c0_34] : memref<16x128xf32, #tpu.memory_space<vmem>>, vector<16x128xf32>
    tpu.vector_store %arg8[%c0_33, %c0_34], %50 {strides = array<i32>} : memref<16x128xf32, #tpu.memory_space<vmem>>, vector<16x128xf32>,
    return
  }
  func.func @transform_0(%arg0: i32) -> (i32, i32) {
    %c0_i32 = arith.constant 0 : i32
    %c0_i32_0 = arith.constant 0 : i32
    return %arg0, %c0_i32 : i32, i32
  }
  func.func @transform_1(%arg0: i32) -> (i32, i32) {
    %c0_i32 = arith.constant 0 : i32
    %c0_i32_0 = arith.constant 0 : i32
    %c0_i32_1 = arith.constant 0 : i32
    return %c0_i32, %c0_i32_0 : i32, i32
  }
  func.func @transform_2(%arg0: i32) -> (i32, i32) {
    %c0_i32 = arith.constant 0 : i32
    %c0_i32_0 = arith.constant 0 : i32
    %c0_i32_1 = arith.constant 0 : i32
    return %c0_i32, %c0_i32_0 : i32, i32
  }
  func.func @transform_3(%arg0: i32) -> (i32, i32, i32) {
    %c0_i32 = arith.constant 0 : i32
    %c0_i32_0 = arith.constant 0 : i32
    %c0_i32_1 = arith.constant 0 : i32
    %c0_i32_2 = arith.constant 0 : i32
    return %c0_i32, %c0_i32_0, %c0_i32_1 : i32, i32, i32
  }
  func.func @transform_4(%arg0: i32) -> (i32, i32, i32) {
    %c0_i32 = arith.constant 0 : i32
    %c0_i32_0 = arith.constant 0 : i32
    %c0_i32_1 = arith.constant 0 : i32
    %c0_i32_2 = arith.constant 0 : i32
    return %c0_i32, %c0_i32_0, %c0_i32_1 : i32, i32, i32
  }
  func.func @transform_5(%arg0: i32) -> (i32, i32) {
    %c0_i32 = arith.constant 0 : i32
    %c0_i32_0 = arith.constant 0 : i32
    %c0_i32_1 = arith.constant 0 : i32
    return %c0_i32, %c0_i32_0 : i32, i32
  }
  func.func @transform_6(%arg0: i32) -> (i32, i32) {
    %c0_i32 = arith.constant 0 : i32
    %c0_i32_0 = arith.constant 0 : i32
    %c0_i32_1 = arith.constant 0 : i32
    return %c0_i32, %c0_i32_0 : i32, i32
  }
  func.func @transform_7(%arg0: i32) -> (i32, i32) {
    %c0_i32 = arith.constant 0 : i32
    %c0_i32_0 = arith.constant 0 : i32
    return %arg0, %c0_i32 : i32, i32
  }
}

module attributes {stable_mosaic.version = 11 : i64} {
  func.func @_resident_kernel(%arg0: i32, %arg1: memref<16x128xbf16, #tpu.memory_space<vmem>>, %arg2: memref<128x128xbf16, #tpu.memory_space<vmem>>, %arg3: memref<1x128xf32, #tpu.memory_space<vmem>>, %arg4: memref<3x128x128xbf16, #tpu.memory_space<vmem>>, %arg5: memref<3x1x128xf32, #tpu.memory_space<vmem>>, %arg6: memref<128x128xbf16, #tpu.memory_space<vmem>>, %arg7: memref<1x128xf32, #tpu.memory_space<vmem>>, %arg8: memref<16x128xf32, #tpu.memory_space<vmem>>) attributes {dimension_semantics = [#tpu.dimension_semantics<parallel>], iteration_bounds = array<i64: 1>, scalar_prefetch = 0 : i64, scratch_operands = 0 : i64, tpu.core_type = #tpu.core_type<tc>, window_params = [{transform_indices = @transform_0, window_bounds = array<i64: 16, 128>}, {pipeline_mode = #tpu.pipeline_mode<synchronous>, transform_indices = @transform_1, window_bounds = array<i64: 128, 128>}, {pipeline_mode = #tpu.pipeline_mode<synchronous>, transform_indices = @transform_2, window_bounds = array<i64: 1, 128>}, {pipeline_mode = #tpu.pipeline_mode<synchronous>, transform_indices = @transform_3, window_bounds = array<i64: 3, 128, 128>}, {pipeline_mode = #tpu.pipeline_mode<synchronous>, transform_indices = @transform_4, window_bounds = array<i64: 3, 1, 128>}, {pipeline_mode = #tpu.pipeline_mode<synchronous>, transform_indices = @transform_5, window_bounds = array<i64: 128, 128>}, {pipeline_mode = #tpu.pipeline_mode<synchronous>, transform_indices = @transform_6, window_bounds = array<i64: 1, 128>}, {transform_indices = @transform_7, window_bounds = array<i64: 16, 128>}]} {
    %c0 = arith.constant 0 : index
    %c0_0 = arith.constant 0 : index
    %0 = vector.load %arg1[%c0, %c0_0] : memref<16x128xbf16, #tpu.memory_space<vmem>>, vector<16x128xbf16>
    %c0_1 = arith.constant 0 : index
    %c0_2 = arith.constant 0 : index
    %1 = vector.load %arg2[%c0_1, %c0_2] : memref<128x128xbf16, #tpu.memory_space<vmem>>, vector<128x128xbf16>
    %cst = arith.constant dense<0.000000e+00> : vector<16x128xf32>
    %2 = tpu.matmul %0, %1, %cst {dimension_numbers = #tpu.dot_dimension_numbers<[1], [0], [0], [1], [0, 0, 1, 1], [], []>} : vector<16x128xbf16>, vector<128x128xbf16>, vector<16x128xf32> -> vector<16x128xf32>
    %c0_3 = arith.constant 0 : index
    %c0_4 = arith.constant 0 : index
    %3 = vector.load %arg3[%c0_3, %c0_4] : memref<1x128xf32, #tpu.memory_space<vmem>>, vector<1x128xf32>
    %4 = vector.broadcast %3 : vector<1x128xf32> to vector<16x128xf32>
    %5 = arith.addf %2, %4 : vector<16x128xf32>
    %cst_5 = arith.constant 1.500000e-01 : f32
    %6 = vector.broadcast %cst_5 : f32 to vector<16x128xf32>
    %7 = arith.mulf %6, %5 : vector<16x128xf32>
    %8 = arith.maximumf %5, %7 : vector<16x128xf32>
    %9 = arith.truncf %8 : vector<16x128xf32> to vector<16x128xbf16>
    %c0_6 = arith.constant 0 : index
    %c0_7 = arith.constant 0 : index
    %c0_8 = arith.constant 0 : index
    %10 = vector.load %arg4[%c0_6, %c0_7, %c0_8] : memref<3x128x128xbf16, #tpu.memory_space<vmem>>, vector<1x128x128xbf16>
    %11 = vector.shape_cast %10 : vector<1x128x128xbf16> to vector<128x128xbf16>
    %cst_9 = arith.constant dense<0.000000e+00> : vector<16x128xf32>
    %12 = tpu.matmul %9, %11, %cst_9 {dimension_numbers = #tpu.dot_dimension_numbers<[1], [0], [0], [1], [0, 0, 1, 1], [], []>} : vector<16x128xbf16>, vector<128x128xbf16>, vector<16x128xf32> -> vector<16x128xf32>
    %c0_10 = arith.constant 0 : index
    %c0_11 = arith.constant 0 : index
    %c0_12 = arith.constant 0 : index
    %13 = vector.load %arg5[%c0_10, %c0_11, %c0_12] : memref<3x1x128xf32, #tpu.memory_space<vmem>>, vector<1x1x128xf32>
    %14 = vector.shape_cast %13 : vector<1x1x128xf32> to vector<1x128xf32>
    %15 = vector.broadcast %14 : vector<1x128xf32> to vector<16x128xf32>
    %16 = arith.addf %12, %15 : vector<16x128xf32>
    %cst_13 = arith.constant 1.500000e-01 : f32
    %17 = vector.broadcast %cst_13 : f32 to vector<16x128xf32>
    %18 = arith.mulf %17, %16 : vector<16x128xf32>
    %19 = arith.maximumf %16, %18 : vector<16x128xf32>
    %20 = arith.addf %8, %19 : vector<16x128xf32>
    %21 = arith.truncf %20 : vector<16x128xf32> to vector<16x128xbf16>
    %c1 = arith.constant 1 : index
    %c0_14 = arith.constant 0 : index
    %c0_15 = arith.constant 0 : index
    %22 = vector.load %arg4[%c1, %c0_14, %c0_15] : memref<3x128x128xbf16, #tpu.memory_space<vmem>>, vector<1x128x128xbf16>
    %23 = vector.shape_cast %22 : vector<1x128x128xbf16> to vector<128x128xbf16>
    %cst_16 = arith.constant dense<0.000000e+00> : vector<16x128xf32>
    %24 = tpu.matmul %21, %23, %cst_16 {dimension_numbers = #tpu.dot_dimension_numbers<[1], [0], [0], [1], [0, 0, 1, 1], [], []>} : vector<16x128xbf16>, vector<128x128xbf16>, vector<16x128xf32> -> vector<16x128xf32>
    %c1_17 = arith.constant 1 : index
    %c0_18 = arith.constant 0 : index
    %c0_19 = arith.constant 0 : index
    %25 = vector.load %arg5[%c1_17, %c0_18, %c0_19] : memref<3x1x128xf32, #tpu.memory_space<vmem>>, vector<1x1x128xf32>
    %26 = vector.shape_cast %25 : vector<1x1x128xf32> to vector<1x128xf32>
    %27 = vector.broadcast %26 : vector<1x128xf32> to vector<16x128xf32>
    %28 = arith.addf %24, %27 : vector<16x128xf32>
    %cst_20 = arith.constant 1.500000e-01 : f32
    %29 = vector.broadcast %cst_20 : f32 to vector<16x128xf32>
    %30 = arith.mulf %29, %28 : vector<16x128xf32>
    %31 = arith.maximumf %28, %30 : vector<16x128xf32>
    %32 = arith.addf %20, %31 : vector<16x128xf32>
    %33 = arith.truncf %32 : vector<16x128xf32> to vector<16x128xbf16>
    %c2 = arith.constant 2 : index
    %c0_21 = arith.constant 0 : index
    %c0_22 = arith.constant 0 : index
    %34 = vector.load %arg4[%c2, %c0_21, %c0_22] : memref<3x128x128xbf16, #tpu.memory_space<vmem>>, vector<1x128x128xbf16>
    %35 = vector.shape_cast %34 : vector<1x128x128xbf16> to vector<128x128xbf16>
    %cst_23 = arith.constant dense<0.000000e+00> : vector<16x128xf32>
    %36 = tpu.matmul %33, %35, %cst_23 {dimension_numbers = #tpu.dot_dimension_numbers<[1], [0], [0], [1], [0, 0, 1, 1], [], []>} : vector<16x128xbf16>, vector<128x128xbf16>, vector<16x128xf32> -> vector<16x128xf32>
    %c2_24 = arith.constant 2 : index
    %c0_25 = arith.constant 0 : index
    %c0_26 = arith.constant 0 : index
    %37 = vector.load %arg5[%c2_24, %c0_25, %c0_26] : memref<3x1x128xf32, #tpu.memory_space<vmem>>, vector<1x1x128xf32>
    %38 = vector.shape_cast %37 : vector<1x1x128xf32> to vector<1x128xf32>
    %39 = vector.broadcast %38 : vector<1x128xf32> to vector<16x128xf32>
    %40 = arith.addf %36, %39 : vector<16x128xf32>
    %cst_27 = arith.constant 1.500000e-01 : f32
    %41 = vector.broadcast %cst_27 : f32 to vector<16x128xf32>
    %42 = arith.mulf %41, %40 : vector<16x128xf32>
    %43 = arith.maximumf %40, %42 : vector<16x128xf32>
    %44 = arith.addf %32, %43 : vector<16x128xf32>
    %45 = arith.truncf %44 : vector<16x128xf32> to vector<16x128xbf16>
    %c0_28 = arith.constant 0 : index
    %c0_29 = arith.constant 0 : index
    %46 = vector.load %arg6[%c0_28, %c0_29] : memref<128x128xbf16, #tpu.memory_space<vmem>>, vector<128x128xbf16>
    %cst_30 = arith.constant dense<0.000000e+00> : vector<16x128xf32>
    %47 = tpu.matmul %45, %46, %cst_30 {dimension_numbers = #tpu.dot_dimension_numbers<[1], [0], [0], [1], [0, 0, 1, 1], [], []>} : vector<16x128xbf16>, vector<128x128xbf16>, vector<16x128xf32> -> vector<16x128xf32>
    %c0_31 = arith.constant 0 : index
    %c0_32 = arith.constant 0 : index
    %48 = vector.load %arg7[%c0_31, %c0_32] : memref<1x128xf32, #tpu.memory_space<vmem>>, vector<1x128xf32>
    %49 = vector.broadcast %48 : vector<1x128xf32> to vector<16x128xf32>
    %50 = arith.addf %47, %49 : vector<16x128xf32>
    %c0_33 = arith.constant 0 : index
    %c0_34 = arith.constant 0 : index
    %51 = vector.load %arg8[%c0_33, %c0_34] : memref<16x128xf32, #tpu.memory_space<vmem>>, vector<16x128xf32>
    tpu.vector_store %arg8[%c0_33, %c0_34], %50 {strides = array<i32>} : memref<16x128xf32, #tpu.memory_space<vmem>>, vector<16x128xf32>,
    return
  }
  func.func @transform_0(%arg0: i32) -> (i32, i32) {
    %c0_i32 = arith.constant 0 : i32
    %c0_i32_0 = arith.constant 0 : i32
    return %arg0, %c0_i32 : i32, i32
  }
  func.func @transform_1(%arg0: i32) -> (i32, i32) {
    %c0_i32 = arith.constant 0 : i32
    %c0_i32_0 = arith.constant 0 : i32
    %c0_i32_1 = arith.constant 0 : i32
    return %c0_i32, %c0_i32_0 : i32, i32
  }
  func.func @transform_2(%arg0: i32) -> (i32, i32) {
    %c0_i32 = arith.constant 0 : i32
    %c0_i32_0 = arith.constant 0 : i32
    %c0_i32_1 = arith.constant 0 : i32
    return %c0_i32, %c0_i32_0 : i32, i32
  }
  func.func @transform_3(%arg0: i32) -> (i32, i32, i32) {
    %c0_i32 = arith.constant 0 : i32
    %c0_i32_0 = arith.constant 0 : i32
    %c0_i32_1 = arith.constant 0 : i32
    %c0_i32_2 = arith.constant 0 : i32
    return %c0_i32, %c0_i32_0, %c0_i32_1 : i32, i32, i32
  }
  func.func @transform_4(%arg0: i32) -> (i32, i32, i32) {
    %c0_i32 = arith.constant 0 : i32
    %c0_i32_0 = arith.constant 0 : i32
    %c0_i32_1 = arith.constant 0 : i32
    %c0_i32_2 = arith.constant 0 : i32
    return %c0_i32, %c0_i32_0, %c0_i32_1 : i32, i32, i32
  }
  func.func @transform_5(%arg0: i32) -> (i32, i32) {
    %c0_i32 = arith.constant 0 : i32
    %c0_i32_0 = arith.constant 0 : i32
    %c0_i32_1 = arith.constant 0 : i32
    return %c0_i32, %c0_i32_0 : i32, i32
  }
  func.func @transform_6(%arg0: i32) -> (i32, i32) {
    %c0_i32 = arith.constant 0 : i32
    %c0_i32_0 = arith.constant 0 : i32
    %c0_i32_1 = arith.constant 0 : i32
    return %c0_i32, %c0_i32_0 : i32, i32
  }
  func.func @transform_7(%arg0: i32) -> (i32, i32) {
    %c0_i32 = arith.constant 0 : i32
    %c0_i32_0 = arith.constant 0 : i32
    return %arg0, %c0_i32 : i32, i32
  }
}

</mosaic_0001>

<bundles_post_ra>
// kernel: tpu_custom_call.1
= control target key start
LH: loop header
LB: loop body
LE: loop exit
PB: predicated region body
PF: predicated region fallthrough
CT: control target
= control target key end

     0   :  { %12 = vsyncpa [#allocation3], 0  ;;  %s1028_s0 = inlined_call_operand.hbm [shape: bf16[16,128], index: 0, kind: input, shape index: {}]   ;;  %s1029_s1 = inlined_call_operand.hbm [shape: bf16[128,128], index: 1, kind: input, shape index: {}]   ;;  %s1030_s2 = inlined_call_operand.hbm [shape: f32[1,128], index: 2, kind: input, shape index: {}]   ;;  %s1031_s3 = inlined_call_operand.hbm [shape: bf16[3,128,128], index: 3, kind: input, shape index: {}]   ;;  %s1032_s4 = inlined_call_operand.vmem [shape: f32[3,1,128], index: 4, kind: input, shape index: {}]   ;;  %s1033_s5 = inlined_call_operand.hbm [shape: bf16[128,128], index: 5, kind: input, shape index: {}]   ;;  %s1034_s6 = inlined_call_operand.vmem [shape: f32[1,128], index: 6, kind: input, shape index: {}]   ;;  %s1035_s7 = inlined_call_operand.hbm [shape: f32[16,128], index: 7, kind: output, shape index: {}]  }
   0x1   :  { %13 = vsyncpa [#allocation6], 0 }
   0x2   :  { %14 = vsyncpa [#allocation9], 0 }
   0x3   :  { %15 = vsyncpa [#allocation4], 0  ;;  %s33_s26 = sshll.u32 %s1029_s1, 4  ;;  %s948_s27 = smov [#allocation5]   ;;  %s34_s26 = int_to_ptr.hbm [resolvable:$true] %s33_s26 }
   0x4   :  { %s35_s28 = sshll.u32 %s948_s27, 4  ;;  %s57_s8 = sshll.u32 %s1031_s3, 4  ;;  %s36_s28 = int_to_ptr.vmem [resolvable:$true] %s35_s28  ;;  %s58_s8 = int_to_ptr.hbm [resolvable:$true] %s57_s8 }
   0x5   :  { %s949_s9 = smov 64   ;;  %s950_s10 = smov 4  }
   0x6   :  { %41 = dma.hbm_to_vmem [thread:$0]  %s34_s26, 1024, %s36_s28, [#allocation6], %s949_s9, %s949_s9, %s950_s10  }
   0x7   :  { %s951_s11 = smov [#allocation8]   ;;  %s20_s15 = sshll.u32 %s1028_s0, 4  ;;  %s21_s15 = int_to_ptr.hbm [resolvable:$true] %s20_s15 }
   0x8   :  { %s59_s12 = sshll.u32 %s951_s11, 4  ;;  %s47_s17 = sshll.u32 %s1030_s2, 4  ;;  %s60_s12 = int_to_ptr.vmem [resolvable:$true] %s59_s12  ;;  %s48_s17 = int_to_ptr.hbm [resolvable:$true] %s47_s17 }
   0x9   :  { %65 = dma.hbm_to_vmem [thread:$0]  %s58_s8, 3072, %s60_s12, [#allocation9], %s949_s9, %s949_s9, %s950_s10  }
   0xa   :  { %s952_s18 = smov [#allocation2]   ;;  %s953_s3 = smov [#allocation7]  }
   0xb   :  { %s22_s19 = sshll.u32 %s952_s18, 4  ;;  %s49_s20 = sshll.u32 %s953_s3, 4  ;;  %s23_s19 = int_to_ptr.vmem [resolvable:$true] %s22_s19  ;;  %s50_s20 = int_to_ptr.vmem [resolvable:$true] %s49_s20 }
   0xc   :  { %28 = dma.hbm_to_vmem [thread:$0]  %s21_s15, 128, %s23_s19, [#allocation3], %s949_s9, %s949_s9, %s950_s10  }
   0xd   :  { %s72_s23 = sshll.u32 %s1033_s5, 4  ;;  %s954_s0 = smov [#allocation10]   ;;  %s73_s23 = int_to_ptr.hbm [resolvable:$true] %s72_s23 }
   0xe   :  { %52 = dma.hbm_to_vmem [thread:$0]  %s48_s17, 16, %s50_s20, [#allocation6]  }
   0xf   :  { %s74_s24 = sshll.u32 %s954_s0, 4  ;;  %s75_s24 = int_to_ptr.vmem [resolvable:$true] %s74_s24 }
  0x10   :  { %80 = dma.hbm_to_vmem [thread:$0]  %s73_s23, 1024, %s75_s24, [#allocation9], %s949_s9, %s949_s9, %s950_s10  }
  0x11   :  { %940 = dma.done.wait [#allocation3], 128  }
  0x12   :  { %941 = vsyncadd [#allocation3], 4294967168 }
  0x13   :  { %942 = dma.done.wait [#allocation6], 1040  }
  0x14   :  { %943 = vsyncadd [#allocation6], 4294966256 }
  0x15   :  { %944 = dma.done.wait [#allocation9], 4096  }
  0x16   :  { %945 = vsyncadd [#allocation9], 4294963200  ;;  %v748_v0 = vld [vmem:[#allocation5 + $0x38] sm:$0xff]  ;;  %v747_v1 = vld [vmem:[#allocation5 + $0x30] sm:$0xff]  ;;  %s559_s11 = sshll.u32 %s1035_s7, 4  ;;  %s956_s12 = smov 128   ;;  %s560_s11 = int_to_ptr.hbm [resolvable:$true] %s559_s11 }
  0x17   :  { %179 = vmatpush.bf16.msra.mxu0 %v748_v0  ;;  %v756_v2 = vld [vmem:[#allocation8 + $0x38] sm:$0xff]  ;;  %v755_v3 = vld [vmem:[#allocation8 + $0x30] sm:$0xff]  ;;  %v746_v4 = vld [vmem:[#allocation5 + $0x28] sm:$0xff]  ;;  %s957_s13 = smov 8  }
  0x18   :  { %266 = vmatpush.bf16.msra.mxu1 %v756_v2  ;;  %v754_v5 = vld [vmem:[#allocation8 + $0x28] sm:$0xff]  ;;  %v745_v6 = vld [vmem:[#allocation5 + $0x20] sm:$0xff]  ;;  %v744_v8 = vld [vmem:[#allocation5 + $0x18] sm:$0xff] }
  0x19   :  { %v753_v7 = vld [vmem:[#allocation8 + $0x20] sm:$0xff]  ;;  %v743_v9 = vld [vmem:[#allocation5 + $0x10] sm:$0xff]  ;;  %v740_v12 = vld [vmem:[#allocation2] sm:$0xff] }
  0x1a   :  { %v742_v10 = vld [vmem:[#allocation5 + $0x8] sm:$0xff]  ;;  %v741_v11 = vld [vmem:[#allocation5] sm:$0xff]  ;;  %v751_v14 = vld [vmem:[#allocation8 + $0x10] sm:$0xff] }
  0x1b   :  { %180 = vmatpush.bf16.msra.mxu0 %v747_v1  ;;  %v752_v13 = vld [vmem:[#allocation8 + $0x18] sm:$0xff]  ;;  %v750_v15 = vld [vmem:[#allocation8 + $0x8] sm:$0xff]  ;;  %v749_v16 = vld [vmem:[#allocation8] sm:$0xff] }
  0x1c   :  { %267 = vmatpush.bf16.msra.mxu1 %v755_v3  ;;  %v764_v17 = vld [vmem:[#allocation8 + $0x78] sm:$0xff]  ;;  %v763_v18 = vld [vmem:[#allocation8 + $0x70] sm:$0xff]  ;;  %v762_v19 = vld [vmem:[#allocation8 + $0x68] sm:$0xff] }
  0x1d   :  { %357 = vmatpush.bf16.msra.mxu2 %v764_v17  ;;  %v791_v21 = vld [vmem:[#allocation7] ss:$0 sm:$0xff]  ;;  %v761_v30 = vld [vmem:[#allocation8 + $0x60] sm:$0xff]  ;;  %v759_v32 = vld [vmem:[#allocation8 + $0x50] sm:$0xff] }
  0x1e   :  { %v760_v31 = vld [vmem:[#allocation8 + $0x58] sm:$0xff]  ;;  %v758_v33 = vld [vmem:[#allocation8 + $0x48] sm:$0xff]  ;;  %v757_v34 = vld [vmem:[#allocation8 + $0x40] sm:$0xff] }
  0x1f   :  { %181 = vmatpush.bf16.msra.mxu0 %v746_v4  ;;  %v772_v35 = vld [vmem:[#allocation8 + $0xb8] sm:$0xff]  ;;  %v771_v36 = vld [vmem:[#allocation8 + $0xb0] sm:$0xff]  ;;  %v770_v37 = vld [vmem:[#allocation8 + $0xa8] sm:$0xff] }
  0x20   :  { %268 = vmatpush.bf16.msra.mxu1 %v754_v5  ;;  %448 = vmatpush.bf16.msra.mxu3 %v772_v35  ;;  %v792_v38 = vld [vmem:[%s1032_s4] ss:$0 sm:$0xff]  ;;  %v769_v50 = vld [vmem:[#allocation8 + $0xa0] sm:$0xff]  ;;  %v768_v51 = vld [vmem:[#allocation8 + $0x98] sm:$0xff] }
  0x21   :  { %358 = vmatpush.bf16.msra.mxu2 %v763_v18  ;;  %v767_v52 = vld [vmem:[#allocation8 + $0x90] sm:$0xff]  ;;  %v766_v53 = vld [vmem:[#allocation8 + $0x88] sm:$0xff]  ;;  %v765_v54 = vld [vmem:[#allocation8 + $0x80] sm:$0xff] }
  0x22   :  { %v780_v55 = vld [vmem:[#allocation10 + $0x38] sm:$0xff]  ;;  %v779_v56 = vld [vmem:[#allocation10 + $0x30] sm:$0xff]  ;;  %v778_v57 = vld [vmem:[#allocation10 + $0x28] sm:$0xff] }
  0x23   :  { %182 = vmatpush.bf16.msra.mxu0 %v745_v6  ;;  %v793_v58 = vld [vmem:[%s1032_s4 + $0x1] ss:$0 sm:$0xff]  ;;  %v777_v6 = vld [vmem:[#allocation10 + $0x20] sm:$0xff] }
  0x24   :  { %269 = vmatpush.bf16.msra.mxu1 %v753_v7  ;;  %449 = vmatpush.bf16.msra.mxu3 %v771_v36  ;;  %v776_v7 = vld [vmem:[#allocation10 + $0x18] sm:$0xff] }
  0x25   :  { %359 = vmatpush.bf16.msra.mxu2 %v762_v19 }
  0x27   :  { %183 = vmatpush.bf16.msra.mxu0 %v744_v8  ;;  %v775_v8 = vld [vmem:[#allocation10 + $0x10] sm:$0xff] }
  0x28   :  { %270 = vmatpush.bf16.msra.mxu1 %v752_v13  ;;  %450 = vmatpush.bf16.msra.mxu3 %v770_v37 }
  0x29   :  { %360 = vmatpush.bf16.msra.mxu2 %v761_v30 }
  0x2b   :  { %184 = vmatpush.bf16.msra.mxu0 %v743_v9  ;;  %v774_v9 = vld [vmem:[#allocation10 + $0x8] sm:$0xff] }
  0x2c   :  { %271 = vmatpush.bf16.msra.mxu1 %v751_v14  ;;  %451 = vmatpush.bf16.msra.mxu3 %v769_v50 }
  0x2d   :  { %361 = vmatpush.bf16.msra.mxu2 %v760_v31 }
  0x2f   :  { %185 = vmatpush.bf16.msra.mxu0 %v742_v10  ;;  %v773_v10 = vld [vmem:[#allocation10] sm:$0xff] }
  0x30   :  { %272 = vmatpush.bf16.msra.mxu1 %v750_v15  ;;  %452 = vmatpush.bf16.msra.mxu3 %v768_v51 }
  0x31   :  { %362 = vmatpush.bf16.msra.mxu2 %v759_v32 }
  0x33   :  { %186 = vmatpush.bf16.msra.mxu0 %v741_v11  ;;  %v794_v11 = vld [vmem:[%s1032_s4 + $0x2] ss:$0 sm:$0xff]  ;;  %s955_s4 = smov [#allocation11]  }
  0x34   :  { %273 = vmatpush.bf16.msra.mxu1 %v749_v16  ;;  %453 = vmatpush.bf16.msra.mxu3 %v767_v52  ;;  %s557_s8 = sshll.u32 %s955_s4, 4  ;;  %s558_s8 = int_to_ptr.vmem [resolvable:$true] %s557_s8 }
  0x35   :  { %363 = vmatpush.bf16.msra.mxu2 %v758_v33 }
  0x36   :  { %187 = vmatmul.bf16.vlgmr.msra.gmra.mxu0 %v740_v12 }
  0x37   :  { %537 = vmatpush.bf16.msrb.mxu0 %v780_v55 }
  0x38   :  { %454 = vmatpush.bf16.msra.mxu3 %v766_v53 }
  0x39   :  { %364 = vmatpush.bf16.msra.mxu2 %v757_v34 }
  0x3b   :  { %538 = vmatpush.bf16.msrb.mxu0 %v779_v56 }
  0x3c   :  { %455 = vmatpush.bf16.msra.mxu3 %v765_v54 }
  0x3f   :  { %539 = vmatpush.bf16.msrb.mxu0 %v778_v57 }
  0x43   :  { %540 = vmatpush.bf16.msrb.mxu0 %v777_v6 }
  0x47   :  { %541 = vmatpush.bf16.msrb.mxu0 %v776_v7 }
  0x4b   :  { %542 = vmatpush.bf16.msrb.mxu0 %v775_v8 }
  0x4f   :  { %543 = vmatpush.bf16.msrb.mxu0 %v774_v9 }
  0x53   :  { %544 = vmatpush.bf16.msrb.mxu0 %v773_v10 }
  0xb3   :  { %v188_v20 = vpop.f32.mrf.mxu0 }
  0xb4   :  { %v189_v22 = vadd.f32 %v791_v21, %v188_v20 }
  0xb6   :  { %v193_v24 = vmul.f32 0.15, %v189_v22 }
  0xb8   :  { %v195_v27 = vmax.f32 %v189_v22, %v193_v24 }
  0xbb   :  { %v190_v23 = vpop.f32.mrf.mxu0 }
  0xbc   :  { %v191_v25 = vadd.f32 %v791_v21, %v190_v23  ;;  %v795_v23 = vld [vmem:[%s1034_s6] ss:$0 sm:$0xff] }
  0xbe   :  { %v194_v26 = vmul.f32 0.15, %v191_v25 }
  0xc0   :  { %v196_v28 = vmax.f32 %v191_v25, %v194_v26 }
  0xc2   :  { %v197_v29 = vpack.c.bf16 %v196_v28, %v195_v27 }
  0xc4   :  { %274 = vmatmul.bf16.vlgmr.msra.gmra.mxu1 %v197_v29 }
 0x141   :  { %v275_v39 = vpop.f32.mrf.mxu1 }
 0x142   :  { %v276_v40 = vadd.f32 %v792_v38, %v275_v39 }
 0x144   :  { %v280_v41 = vmul.f32 0.15, %v276_v40 }
 0x146   :  { %v282_v44 = vmax.f32 %v276_v40, %v280_v41 }
 0x148   :  { %v284_v47 = vadd.f32 %v282_v44, %v195_v27 }
 0x149   :  { %v277_v42 = vpop.f32.mrf.mxu1 }
 0x14a   :  { %v278_v43 = vadd.f32 %v792_v38, %v277_v42 }
 0x14c   :  { %v281_v45 = vmul.f32 0.15, %v278_v43 }
 0x14e   :  { %v283_v46 = vmax.f32 %v278_v43, %v281_v45 }
 0x150   :  { %v285_v48 = vadd.f32 %v283_v46, %v196_v28 }
 0x152   :  { %v286_v49 = vpack.c.bf16 %v285_v48, %v284_v47 }
 0x154   :  { %365 = vmatmul.bf16.vlgmr.msra.gmra.mxu2 %v286_v49 }
 0x1d7   :  { %v366_v59 = vpop.f32.mrf.mxu2 }
 0x1d8   :  { %v367_v60 = vadd.f32 %v793_v58, %v366_v59 }
 0x1da   :  { %v371_v61 = vmul.f32 0.15, %v367_v60 }
 0x1dc   :  { %v373_v0 = vmax.f32 %v367_v60, %v371_v61 }
 0x1de   :  { %v375_v3 = vadd.f32 %v373_v0, %v284_v47 }
 0x1df   :  { %v368_v62 = vpop.f32.mrf.mxu2 }
 0x1e0   :  { %v369_v63 = vadd.f32 %v793_v58, %v368_v62 }
 0x1e2   :  { %v372_v1 = vmul.f32 0.15, %v369_v63 }
 0x1e4   :  { %v374_v2 = vmax.f32 %v369_v63, %v372_v1 }
 0x1e6   :  { %v376_v4 = vadd.f32 %v374_v2, %v285_v48 }
 0x1e8   :  { %v377_v5 = vpack.c.bf16 %v376_v4, %v375_v3 }
 0x1ea   :  { %456 = vmatmul.bf16.vlgmr.msra.gmra.mxu3 %v377_v5 }
 0x26d   :  { %v457_v12 = vpop.f32.mrf.mxu3 }
 0x26e   :  { %v458_v13 = vadd.f32 %v794_v11, %v457_v12 }
 0x270   :  { %v462_v14 = vmul.f32 0.15, %v458_v13 }
 0x272   :  { %v464_v17 = vmax.f32 %v458_v13, %v462_v14 }
 0x274   :  { %v466_v20 = vadd.f32 %v464_v17, %v375_v3 }
 0x275   :  { %v459_v15 = vpop.f32.mrf.mxu3 }
 0x276   :  { %v460_v16 = vadd.f32 %v794_v11, %v459_v15 }
 0x278   :  { %v463_v18 = vmul.f32 0.15, %v460_v16 }
 0x27a   :  { %v465_v19 = vmax.f32 %v460_v16, %v463_v18 }
 0x27c   :  { %v467_v21 = vadd.f32 %v465_v19, %v376_v4 }
 0x27e   :  { %v468_v22 = vpack.c.bf16 %v467_v21, %v466_v20 }
 0x280   :  { %545 = vmatmul.bf16.vlgmr.msrb.gmra.mxu0 %v468_v22 }
 0x2fd   :  { %v546_v24 = vpop.f32.mrf.mxu0 }
 0x2fe   :  { %v547_v25 = vadd.f32 %v795_v23, %v546_v24 }
 0x300   :  { %551 = vst [vmem:[#allocation11] sm:$0xff] %v547_v25 }
 0x305   :  { %v548_v26 = vpop.f32.mrf.mxu0 }
 0x306   :  { %v549_v27 = vadd.f32 %v795_v23, %v548_v26 }
 0x308   :  { %552 = vst [vmem:[#allocation11 + $0x8] sm:$0xff] %v549_v27 }
 0x309   :  { %565 = dma.vmem_to_hbm [thread:$0]  %s558_s8, 256, %s560_s11, [#allocation4], %s956_s12, %s956_s12, %s957_s13  }
 0x30a   :  { %946 = dma.done.wait [#allocation4], 256  }
 0x30b   :  { %947 = vsyncadd [#allocation4], 4294967040 }
 0x30c   :  { %570 = vsyncpa [#allocation3], 1 }
 0x30d   :  { %571 = vsyncpa [#allocation6], 1 }
 0x30e   :  { %572 = vsyncpa [#allocation9], 1 }
 0x30f   :  { %573 = vsyncpa [#allocation4], 1 }

// kernel: tpu_custom_call.1
= control target key start
LH: loop header
LB: loop body
LE: loop exit
PB: predicated region body
PF: predicated region fallthrough
CT: control target
= control target key end

     0   :  { %12 = vsyncpa [#allocation3], 0  ;;  %s1028_s0 = inlined_call_operand.hbm [shape: bf16[16,128], index: 0, kind: input, shape index: {}]   ;;  %s1029_s1 = inlined_call_operand.hbm [shape: bf16[128,128], index: 1, kind: input, shape index: {}]   ;;  %s1030_s2 = inlined_call_operand.hbm [shape: f32[1,128], index: 2, kind: input, shape index: {}]   ;;  %s1031_s3 = inlined_call_operand.hbm [shape: bf16[3,128,128], index: 3, kind: input, shape index: {}]   ;;  %s1032_s4 = inlined_call_operand.vmem [shape: f32[3,1,128], index: 4, kind: input, shape index: {}]   ;;  %s1033_s5 = inlined_call_operand.hbm [shape: bf16[128,128], index: 5, kind: input, shape index: {}]   ;;  %s1034_s6 = inlined_call_operand.vmem [shape: f32[1,128], index: 6, kind: input, shape index: {}]   ;;  %s1035_s7 = inlined_call_operand.hbm [shape: f32[16,128], index: 7, kind: output, shape index: {}]  }
   0x1   :  { %13 = vsyncpa [#allocation6], 0 }
   0x2   :  { %14 = vsyncpa [#allocation9], 0 }
   0x3   :  { %15 = vsyncpa [#allocation4], 0  ;;  %s33_s26 = sshll.u32 %s1029_s1, 4  ;;  %s948_s27 = smov [#allocation5]   ;;  %s34_s26 = int_to_ptr.hbm [resolvable:$true] %s33_s26 }
   0x4   :  { %s35_s28 = sshll.u32 %s948_s27, 4  ;;  %s57_s8 = sshll.u32 %s1031_s3, 4  ;;  %s36_s28 = int_to_ptr.vmem [resolvable:$true] %s35_s28  ;;  %s58_s8 = int_to_ptr.hbm [resolvable:$true] %s57_s8 }
   0x5   :  { %s949_s9 = smov 64   ;;  %s950_s10 = smov 4  }
   0x6   :  { %41 = dma.hbm_to_vmem [thread:$0]  %s34_s26, 1024, %s36_s28, [#allocation6], %s949_s9, %s949_s9, %s950_s10  }
   0x7   :  { %s951_s11 = smov [#allocation8]   ;;  %s20_s15 = sshll.u32 %s1028_s0, 4  ;;  %s21_s15 = int_to_ptr.hbm [resolvable:$true] %s20_s15 }
   0x8   :  { %s59_s12 = sshll.u32 %s951_s11, 4  ;;  %s47_s17 = sshll.u32 %s1030_s2, 4  ;;  %s60_s12 = int_to_ptr.vmem [resolvable:$true] %s59_s12  ;;  %s48_s17 = int_to_ptr.hbm [resolvable:$true] %s47_s17 }
   0x9   :  { %65 = dma.hbm_to_vmem [thread:$0]  %s58_s8, 3072, %s60_s12, [#allocation9], %s949_s9, %s949_s9, %s950_s10  }
   0xa   :  { %s952_s18 = smov [#allocation2]   ;;  %s953_s3 = smov [#allocation7]  }
   0xb   :  { %s22_s19 = sshll.u32 %s952_s18, 4  ;;  %s49_s20 = sshll.u32 %s953_s3, 4  ;;  %s23_s19 = int_to_ptr.vmem [resolvable:$true] %s22_s19  ;;  %s50_s20 = int_to_ptr.vmem [resolvable:$true] %s49_s20 }
   0xc   :  { %28 = dma.hbm_to_vmem [thread:$0]  %s21_s15, 128, %s23_s19, [#allocation3], %s949_s9, %s949_s9, %s950_s10  }
   0xd   :  { %s72_s23 = sshll.u32 %s1033_s5, 4  ;;  %s954_s0 = smov [#allocation10]   ;;  %s73_s23 = int_to_ptr.hbm [resolvable:$true] %s72_s23 }
   0xe   :  { %52 = dma.hbm_to_vmem [thread:$0]  %s48_s17, 16, %s50_s20, [#allocation6]  }
   0xf   :  { %s74_s24 = sshll.u32 %s954_s0, 4  ;;  %s75_s24 = int_to_ptr.vmem [resolvable:$true] %s74_s24 }
  0x10   :  { %80 = dma.hbm_to_vmem [thread:$0]  %s73_s23, 1024, %s75_s24, [#allocation9], %s949_s9, %s949_s9, %s950_s10  }
  0x11   :  { %940 = dma.done.wait [#allocation3], 128  }
  0x12   :  { %941 = vsyncadd [#allocation3], 4294967168 }
  0x13   :  { %942 = dma.done.wait [#allocation6], 1040  }
  0x14   :  { %943 = vsyncadd [#allocation6], 4294966256 }
  0x15   :  { %944 = dma.done.wait [#allocation9], 4096  }
  0x16   :  { %945 = vsyncadd [#allocation9], 4294963200  ;;  %v748_v0 = vld [vmem:[#allocation5 + $0x38] sm:$0xff]  ;;  %v747_v1 = vld [vmem:[#allocation5 + $0x30] sm:$0xff]  ;;  %s559_s11 = sshll.u32 %s1035_s7, 4  ;;  %s956_s12 = smov 128   ;;  %s560_s11 = int_to_ptr.hbm [resolvable:$true] %s559_s11 }
  0x17   :  { %179 = vmatpush.bf16.msra.mxu0 %v748_v0  ;;  %v756_v2 = vld [vmem:[#allocation8 + $0x38] sm:$0xff]  ;;  %v755_v3 = vld [vmem:[#allocation8 + $0x30] sm:$0xff]  ;;  %v746_v4 = vld [vmem:[#allocation5 + $0x28] sm:$0xff]  ;;  %s957_s13 = smov 8  }
  0x18   :  { %266 = vmatpush.bf16.msra.mxu1 %v756_v2  ;;  %v754_v5 = vld [vmem:[#allocation8 + $0x28] sm:$0xff]  ;;  %v745_v6 = vld [vmem:[#allocation5 + $0x20] sm:$0xff]  ;;  %v744_v8 = vld [vmem:[#allocation5 + $0x18] sm:$0xff] }
  0x19   :  { %v753_v7 = vld [vmem:[#allocation8 + $0x20] sm:$0xff]  ;;  %v743_v9 = vld [vmem:[#allocation5 + $0x10] sm:$0xff]  ;;  %v740_v12 = vld [vmem:[#allocation2] sm:$0xff] }
  0x1a   :  { %v742_v10 = vld [vmem:[#allocation5 + $0x8] sm:$0xff]  ;;  %v741_v11 = vld [vmem:[#allocation5] sm:$0xff]  ;;  %v751_v14 = vld [vmem:[#allocation8 + $0x10] sm:$0xff] }
  0x1b   :  { %180 = vmatpush.bf16.msra.mxu0 %v747_v1  ;;  %v752_v13 = vld [vmem:[#allocation8 + $0x18] sm:$0xff]  ;;  %v750_v15 = vld [vmem:[#allocation8 + $0x8] sm:$0xff]  ;;  %v749_v16 = vld [vmem:[#allocation8] sm:$0xff] }
  0x1c   :  { %267 = vmatpush.bf16.msra.mxu1 %v755_v3  ;;  %v764_v17 = vld [vmem:[#allocation8 + $0x78] sm:$0xff]  ;;  %v763_v18 = vld [vmem:[#allocation8 + $0x70] sm:$0xff]  ;;  %v762_v19 = vld [vmem:[#allocation8 + $0x68] sm:$0xff] }
  0x1d   :  { %357 = vmatpush.bf16.msra.mxu2 %v764_v17  ;;  %v791_v21 = vld [vmem:[#allocation7] ss:$0 sm:$0xff]  ;;  %v761_v30 = vld [vmem:[#allocation8 + $0x60] sm:$0xff]  ;;  %v759_v32 = vld [vmem:[#allocation8 + $0x50] sm:$0xff] }
  0x1e   :  { %v760_v31 = vld [vmem:[#allocation8 + $0x58] sm:$0xff]  ;;  %v758_v33 = vld [vmem:[#allocation8 + $0x48] sm:$0xff]  ;;  %v757_v34 = vld [vmem:[#allocation8 + $0x40] sm:$0xff] }
  0x1f   :  { %181 = vmatpush.bf16.msra.mxu0 %v746_v4  ;;  %v772_v35 = vld [vmem:[#allocation8 + $0xb8] sm:$0xff]  ;;  %v771_v36 = vld [vmem:[#allocation8 + $0xb0] sm:$0xff]  ;;  %v770_v37 = vld [vmem:[#allocation8 + $0xa8] sm:$0xff] }
  0x20   :  { %268 = vmatpush.bf16.msra.mxu1 %v754_v5  ;;  %448 = vmatpush.bf16.msra.mxu3 %v772_v35  ;;  %v792_v38 = vld [vmem:[%s1032_s4] ss:$0 sm:$0xff]  ;;  %v769_v50 = vld [vmem:[#allocation8 + $0xa0] sm:$0xff]  ;;  %v768_v51 = vld [vmem:[#allocation8 + $0x98] sm:$0xff] }
  0x21   :  { %358 = vmatpush.bf16.msra.mxu2 %v763_v18  ;;  %v767_v52 = vld [vmem:[#allocation8 + $0x90] sm:$0xff]  ;;  %v766_v53 = vld [vmem:[#allocation8 + $0x88] sm:$0xff]  ;;  %v765_v54 = vld [vmem:[#allocation8 + $0x80] sm:$0xff] }
  0x22   :  { %v780_v55 = vld [vmem:[#allocation10 + $0x38] sm:$0xff]  ;;  %v779_v56 = vld [vmem:[#allocation10 + $0x30] sm:$0xff]  ;;  %v778_v57 = vld [vmem:[#allocation10 + $0x28] sm:$0xff] }
  0x23   :  { %182 = vmatpush.bf16.msra.mxu0 %v745_v6  ;;  %v793_v58 = vld [vmem:[%s1032_s4 + $0x1] ss:$0 sm:$0xff]  ;;  %v777_v6 = vld [vmem:[#allocation10 + $0x20] sm:$0xff] }
  0x24   :  { %269 = vmatpush.bf16.msra.mxu1 %v753_v7  ;;  %449 = vmatpush.bf16.msra.mxu3 %v771_v36  ;;  %v776_v7 = vld [vmem:[#allocation10 + $0x18] sm:$0xff] }
  0x25   :  { %359 = vmatpush.bf16.msra.mxu2 %v762_v19 }
  0x27   :  { %183 = vmatpush.bf16.msra.mxu0 %v744_v8  ;;  %v775_v8 = vld [vmem:[#allocation10 + $0x10] sm:$0xff] }
  0x28   :  { %270 = vmatpush.bf16.msra.mxu1 %v752_v13  ;;  %450 = vmatpush.bf16.msra.mxu3 %v770_v37 }
  0x29   :  { %360 = vmatpush.bf16.msra.mxu2 %v761_v30 }
  0x2b   :  { %184 = vmatpush.bf16.msra.mxu0 %v743_v9  ;;  %v774_v9 = vld [vmem:[#allocation10 + $0x8] sm:$0xff] }
  0x2c   :  { %271 = vmatpush.bf16.msra.mxu1 %v751_v14  ;;  %451 = vmatpush.bf16.msra.mxu3 %v769_v50 }
  0x2d   :  { %361 = vmatpush.bf16.msra.mxu2 %v760_v31 }
  0x2f   :  { %185 = vmatpush.bf16.msra.mxu0 %v742_v10  ;;  %v773_v10 = vld [vmem:[#allocation10] sm:$0xff] }
  0x30   :  { %272 = vmatpush.bf16.msra.mxu1 %v750_v15  ;;  %452 = vmatpush.bf16.msra.mxu3 %v768_v51 }
  0x31   :  { %362 = vmatpush.bf16.msra.mxu2 %v759_v32 }
  0x33   :  { %186 = vmatpush.bf16.msra.mxu0 %v741_v11  ;;  %v794_v11 = vld [vmem:[%s1032_s4 + $0x2] ss:$0 sm:$0xff]  ;;  %s955_s4 = smov [#allocation11]  }
  0x34   :  { %273 = vmatpush.bf16.msra.mxu1 %v749_v16  ;;  %453 = vmatpush.bf16.msra.mxu3 %v767_v52  ;;  %s557_s8 = sshll.u32 %s955_s4, 4  ;;  %s558_s8 = int_to_ptr.vmem [resolvable:$true] %s557_s8 }
  0x35   :  { %363 = vmatpush.bf16.msra.mxu2 %v758_v33 }
  0x36   :  { %187 = vmatmul.bf16.vlgmr.msra.gmra.mxu0 %v740_v12 }
  0x37   :  { %537 = vmatpush.bf16.msrb.mxu0 %v780_v55 }
  0x38   :  { %454 = vmatpush.bf16.msra.mxu3 %v766_v53 }
  0x39   :  { %364 = vmatpush.bf16.msra.mxu2 %v757_v34 }
  0x3b   :  { %538 = vmatpush.bf16.msrb.mxu0 %v779_v56 }
  0x3c   :  { %455 = vmatpush.bf16.msra.mxu3 %v765_v54 }
  0x3f   :  { %539 = vmatpush.bf16.msrb.mxu0 %v778_v57 }
  0x43   :  { %540 = vmatpush.bf16.msrb.mxu0 %v777_v6 }
  0x47   :  { %541 = vmatpush.bf16.msrb.mxu0 %v776_v7 }
  0x4b   :  { %542 = vmatpush.bf16.msrb.mxu0 %v775_v8 }
  0x4f   :  { %543 = vmatpush.bf16.msrb.mxu0 %v774_v9 }
  0x53   :  { %544 = vmatpush.bf16.msrb.mxu0 %v773_v10 }
  0xb3   :  { %v188_v20 = vpop.f32.mrf.mxu0 }
  0xb4   :  { %v189_v22 = vadd.f32 %v791_v21, %v188_v20 }
  0xb6   :  { %v193_v24 = vmul.f32 0.15, %v189_v22 }
  0xb8   :  { %v195_v27 = vmax.f32 %v189_v22, %v193_v24 }
  0xbb   :  { %v190_v23 = vpop.f32.mrf.mxu0 }
  0xbc   :  { %v191_v25 = vadd.f32 %v791_v21, %v190_v23  ;;  %v795_v23 = vld [vmem:[%s1034_s6] ss:$0 sm:$0xff] }
  0xbe   :  { %v194_v26 = vmul.f32 0.15, %v191_v25 }
  0xc0   :  { %v196_v28 = vmax.f32 %v191_v25, %v194_v26 }
  0xc2   :  { %v197_v29 = vpack.c.bf16 %v196_v28, %v195_v27 }
  0xc4   :  { %274 = vmatmul.bf16.vlgmr.msra.gmra.mxu1 %v197_v29 }
 0x141   :  { %v275_v39 = vpop.f32.mrf.mxu1 }
 0x142   :  { %v276_v40 = vadd.f32 %v792_v38, %v275_v39 }
 0x144   :  { %v280_v41 = vmul.f32 0.15, %v276_v40 }
 0x146   :  { %v282_v44 = vmax.f32 %v276_v40, %v280_v41 }
 0x148   :  { %v284_v47 = vadd.f32 %v282_v44, %v195_v27 }
 0x149   :  { %v277_v42 = vpop.f32.mrf.mxu1 }
 0x14a   :  { %v278_v43 = vadd.f32 %v792_v38, %v277_v42 }
 0x14c   :  { %v281_v45 = vmul.f32 0.15, %v278_v43 }
 0x14e   :  { %v283_v46 = vmax.f32 %v278_v43, %v281_v45 }
 0x150   :  { %v285_v48 = vadd.f32 %v283_v46, %v196_v28 }
 0x152   :  { %v286_v49 = vpack.c.bf16 %v285_v48, %v284_v47 }
 0x154   :  { %365 = vmatmul.bf16.vlgmr.msra.gmra.mxu2 %v286_v49 }
 0x1d7   :  { %v366_v59 = vpop.f32.mrf.mxu2 }
 0x1d8   :  { %v367_v60 = vadd.f32 %v793_v58, %v366_v59 }
 0x1da   :  { %v371_v61 = vmul.f32 0.15, %v367_v60 }
 0x1dc   :  { %v373_v0 = vmax.f32 %v367_v60, %v371_v61 }
 0x1de   :  { %v375_v3 = vadd.f32 %v373_v0, %v284_v47 }
 0x1df   :  { %v368_v62 = vpop.f32.mrf.mxu2 }
 0x1e0   :  { %v369_v63 = vadd.f32 %v793_v58, %v368_v62 }
 0x1e2   :  { %v372_v1 = vmul.f32 0.15, %v369_v63 }
 0x1e4   :  { %v374_v2 = vmax.f32 %v369_v63, %v372_v1 }
 0x1e6   :  { %v376_v4 = vadd.f32 %v374_v2, %v285_v48 }
 0x1e8   :  { %v377_v5 = vpack.c.bf16 %v376_v4, %v375_v3 }
 0x1ea   :  { %456 = vmatmul.bf16.vlgmr.msra.gmra.mxu3 %v377_v5 }
 0x26d   :  { %v457_v12 = vpop.f32.mrf.mxu3 }
 0x26e   :  { %v458_v13 = vadd.f32 %v794_v11, %v457_v12 }
 0x270   :  { %v462_v14 = vmul.f32 0.15, %v458_v13 }
 0x272   :  { %v464_v17 = vmax.f32 %v458_v13, %v462_v14 }
 0x274   :  { %v466_v20 = vadd.f32 %v464_v17, %v375_v3 }
 0x275   :  { %v459_v15 = vpop.f32.mrf.mxu3 }
 0x276   :  { %v460_v16 = vadd.f32 %v794_v11, %v459_v15 }
 0x278   :  { %v463_v18 = vmul.f32 0.15, %v460_v16 }
 0x27a   :  { %v465_v19 = vmax.f32 %v460_v16, %v463_v18 }
 0x27c   :  { %v467_v21 = vadd.f32 %v465_v19, %v376_v4 }
 0x27e   :  { %v468_v22 = vpack.c.bf16 %v467_v21, %v466_v20 }
 0x280   :  { %545 = vmatmul.bf16.vlgmr.msrb.gmra.mxu0 %v468_v22 }
 0x2fd   :  { %v546_v24 = vpop.f32.mrf.mxu0 }
 0x2fe   :  { %v547_v25 = vadd.f32 %v795_v23, %v546_v24 }
 0x300   :  { %551 = vst [vmem:[#allocation11] sm:$0xff] %v547_v25 }
 0x305   :  { %v548_v26 = vpop.f32.mrf.mxu0 }
 0x306   :  { %v549_v27 = vadd.f32 %v795_v23, %v548_v26 }
 0x308   :  { %552 = vst [vmem:[#allocation11 + $0x8] sm:$0xff] %v549_v27 }
 0x309   :  { %565 = dma.vmem_to_hbm [thread:$0]  %s558_s8, 256, %s560_s11, [#allocation4], %s956_s12, %s956_s12, %s957_s13  }
 0x30a   :  { %946 = dma.done.wait [#allocation4], 256  }
 0x30b   :  { %947 = vsyncadd [#allocation4], 4294967040 }
 0x30c   :  { %570 = vsyncpa [#allocation3], 1 }
 0x30d   :  { %571 = vsyncpa [#allocation6], 1 }
 0x30e   :  { %572 = vsyncpa [#allocation9], 1 }
 0x30f   :  { %573 = vsyncpa [#allocation4], 1 }

</bundles_post_ra>
